<compile_context>
chip_gen: v7x
topology: tpu7x:2x2x1
jax: 0.10.0
libtpu: 0.0.40
codegen_flags: <defaults>
</compile_context>

<pallas_src>
import math
import jax
import jax.numpy as jnp
from jax.experimental import pallas as pl
from jax.experimental.pallas import tpu as pltpu

VMEM_LIMIT = 48 * 1024 * 1024     # explicit scoped-VMEM budget (fits v5e/v6e/v7x)


# ---------------------------------------------------------------------------
# helpers
# ---------------------------------------------------------------------------

def _pick_tile(dim, cap, base):
    """Largest tile <= cap that divides dim (multiple of `base` when tiling);
    full-dim block when dim already fits the cap (always layout-legal)."""
    if dim <= cap:
        return dim
    t = (cap // base) * base
    while t >= base:
        if dim % t == 0:
            return t
        t -= base
    return dim


def _split_cap(dim, cap, base):
    """Cap a parallel-axis tile so the axis gets >=2 grid steps when possible
    (keeps both TensorCores busy on v7x); no effect when dim already > cap."""
    if dim >= 2 * base and dim // 2 < cap:
        return max(base, dim // 2)
    return cap


def _gelu_tanh(y):
    # TODO(synk): HF bert-base uses the exact erf GELU; tanh approx differs ~1e-3.
    return 0.5 * y * (1.0 + jnp.tanh(0.7978845608028654 * (y + 0.044715 * y * y * y)))


# ---------------------------------------------------------------------------
# Pallas kernels
# ---------------------------------------------------------------------------

def dense(x, w, b, act=None, out_dtype=jnp.bfloat16,
          tm_cap=512, tn_cap=1024, tk_cap=1536):
    """y = act(x @ w + b). x:[M,K] bf16, w:[K,N] bf16, b:[N]. Tiled MXU matmul with
    f32 accumulation. When K fits one block the accumulator scratch and the K-axis
    init/finalize are dropped entirely."""
    M, K = x.shape
    N = w.shape[1]
    tm = _pick_tile(M, _split_cap(M, tm_cap, 16), 16)
    tn = _pick_tile(N, tn_cap, 128)
    tk = _pick_tile(K, tk_cap, 128)
    b2 = b.reshape(1, N).astype(jnp.float32)

    def _epilogue(y):
        if act == "gelu":
            return _gelu_tanh(y)
        if act == "tanh":
            return jnp.tanh(y)
        return y

    if tk == K:  # single reduction block: no scratch, no pl.when
        def kernel(x_ref, w_ref, b_ref, o_ref):
            y = jnp.dot(x_ref[...], w_ref[...],
                        preferred_element_type=jnp.float32) + b_ref[...]
            o_ref[...] = _epilogue(y).astype(o_ref.dtype)

        return pl.pallas_call(
            kernel,
            out_shape=jax.ShapeDtypeStruct((M, N), out_dtype),
            grid=(M // tm, N // tn),
            in_specs=[
                pl.BlockSpec((tm, K), lambda i, j: (i, 0)),
                pl.BlockSpec((K, tn), lambda i, j: (0, j)),
                pl.BlockSpec((1, tn), lambda i, j: (0, j)),
            ],
            out_specs=pl.BlockSpec((tm, tn), lambda i, j: (i, j)),
            compiler_params=pltpu.CompilerParams(
                dimension_semantics=("parallel", "parallel"),
                vmem_limit_bytes=VMEM_LIMIT),
        )(x, w, b2)

    def kernel(x_ref, w_ref, b_ref, o_ref, acc_ref):
        @pl.when(pl.program_id(2) == 0)
        def _init():
            acc_ref[...] = jnp.zeros_like(acc_ref)

        acc_ref[...] += jnp.dot(x_ref[...], w_ref[...],
                                preferred_element_type=jnp.float32)

        @pl.when(pl.program_id(2) == pl.num_programs(2) - 1)
        def _fin():
            o_ref[...] = _epilogue(acc_ref[...] + b_ref[...]).astype(o_ref.dtype)

    return pl.pallas_call(
        kernel,
        out_shape=jax.ShapeDtypeStruct((M, N), out_dtype),
        grid_spec=pltpu.PrefetchScalarGridSpec(
            num_scalar_prefetch=0,
            grid=(M // tm, N // tn, K // tk),
            in_specs=[
                pl.BlockSpec((tm, tk), lambda i, j, k: (i, k)),
                pl.BlockSpec((tk, tn), lambda i, j, k: (k, j)),
                pl.BlockSpec((1, tn), lambda i, j, k: (0, j)),
            ],
            out_specs=pl.BlockSpec((tm, tn), lambda i, j, k: (i, j)),
            scratch_shapes=[pltpu.VMEM((tm, tn), jnp.float32)],
        ),
        compiler_params=pltpu.CompilerParams(
            dimension_semantics=("parallel", "parallel", "arbitrary"),
            vmem_limit_bytes=VMEM_LIMIT),
    )(x, w, b2)


def dense_add_ln(x, w, b, residual, gamma, beta, eps=1e-12,
                 out_dtype=jnp.bfloat16, tm_cap=512, tk_cap=1536):
    """LayerNorm(residual + x @ w + b): matmul + bias + residual-add + LN fused in
    one kernel (full N per block so the LN reduction stays in-tile). Single-K path
    (K=768 at bert-base) has no accumulator scratch."""
    M, K = x.shape
    N = w.shape[1]
    tm = _pick_tile(M, _split_cap(M, tm_cap, 16), 16)
    tk = _pick_tile(K, tk_cap, 128)
    b2 = b.reshape(1, N).astype(jnp.float32)
    g2 = gamma.reshape(1, N).astype(jnp.float32)
    be2 = beta.reshape(1, N).astype(jnp.float32)

    def _ln(y, g, be):
        mean = jnp.mean(y, axis=-1, keepdims=True)
        c = y - mean
        var = jnp.mean(c * c, axis=-1, keepdims=True)
        return c * jax.lax.rsqrt(var + eps) * g + be

    if tk == K:  # single reduction block
        def kernel(x_ref, w_ref, b_ref, r_ref, g_ref, be_ref, o_ref):
            y = (jnp.dot(x_ref[...], w_ref[...],
                         preferred_element_type=jnp.float32)
                 + b_ref[...] + r_ref[...].astype(jnp.float32))
            o_ref[...] = _ln(y, g_ref[...], be_ref[...]).astype(o_ref.dtype)

        return pl.pallas_call(
            kernel,
            out_shape=jax.ShapeDtypeStruct((M, N), out_dtype),
            grid=(M // tm,),
            in_specs=[
                pl.BlockSpec((tm, K), lambda i: (i, 0)),
                pl.BlockSpec((K, N), lambda i: (0, 0)),
                pl.BlockSpec((1, N), lambda i: (0, 0)),
                pl.BlockSpec((tm, N), lambda i: (i, 0)),
                pl.BlockSpec((1, N), lambda i: (0, 0)),
                pl.BlockSpec((1, N), lambda i: (0, 0)),
            ],
            out_specs=pl.BlockSpec((tm, N), lambda i: (i, 0)),
            compiler_params=pltpu.CompilerParams(
                dimension_semantics=("parallel",),
                vmem_limit_bytes=VMEM_LIMIT),
        )(x, w, b2, residual, g2, be2)

    def kernel(x_ref, w_ref, b_ref, r_ref, g_ref, be_ref, o_ref, acc_ref):
        @pl.when(pl.program_id(1) == 0)
        def _init():
            acc_ref[...] = jnp.zeros_like(acc_ref)

        acc_ref[...] += jnp.dot(x_ref[...], w_ref[...],
                                preferred_element_type=jnp.float32)

        @pl.when(pl.program_id(1) == pl.num_programs(1) - 1)
        def _fin():
            y = acc_ref[...] + b_ref[...] + r_ref[...].astype(jnp.float32)
            o_ref[...] = _ln(y, g_ref[...], be_ref[...]).astype(o_ref.dtype)

    return pl.pallas_call(
        kernel,
        out_shape=jax.ShapeDtypeStruct((M, N), out_dtype),
        grid_spec=pltpu.PrefetchScalarGridSpec(
            num_scalar_prefetch=0,
            grid=(M // tm, K // tk),
            in_specs=[
                pl.BlockSpec((tm, tk), lambda i, k: (i, k)),
                pl.BlockSpec((tk, N), lambda i, k: (k, 0)),
                pl.BlockSpec((1, N), lambda i, k: (0, 0)),
                pl.BlockSpec((tm, N), lambda i, k: (i, 0)),
                pl.BlockSpec((1, N), lambda i, k: (0, 0)),
                pl.BlockSpec((1, N), lambda i, k: (0, 0)),
            ],
            out_specs=pl.BlockSpec((tm, N), lambda i, k: (i, 0)),
            scratch_shapes=[pltpu.VMEM((tm, N), jnp.float32)],
        ),
        compiler_params=pltpu.CompilerParams(
            dimension_semantics=("parallel", "arbitrary"),
            vmem_limit_bytes=VMEM_LIMIT),
    )(x, w, b2, residual, g2, be2)


def embed_layer_norm(word_e, pos_e, type_e, gamma, beta, eps=1e-12,
                     out_dtype=jnp.bfloat16, ts_cap=512):
    """Fused embedding sum (word + position + token-type) + LayerNorm.
    word_e/type_e: [B,S,H] f32 gathers, pos_e: [S,H] f32."""
    B, S, H = word_e.shape
    ts = _pick_tile(S, _split_cap(S, ts_cap, 16), 16)

    def kernel(w_ref, p_ref, t_ref, g_ref, b_ref, o_ref):
        y = w_ref[...] + p_ref[...] + t_ref[...]
        mean = jnp.mean(y, axis=-1, keepdims=True)
        c = y - mean
        var = jnp.mean(c * c, axis=-1, keepdims=True)
        o_ref[...] = (c * jax.lax.rsqrt(var + eps) * g_ref[...]
                      + b_ref[...]).astype(o_ref.dtype)

    return pl.pallas_call(
        kernel,
        out_shape=jax.ShapeDtypeStruct((B, S, H), out_dtype),
        grid=(B, S // ts),
        in_specs=[
            pl.BlockSpec((None, ts, H), lambda b, s: (b, s, 0)),
            pl.BlockSpec((ts, H), lambda b, s: (s, 0)),
            pl.BlockSpec((None, ts, H), lambda b, s: (b, s, 0)),
            pl.BlockSpec((1, H), lambda b, s: (0, 0)),
            pl.BlockSpec((1, H), lambda b, s: (0, 0)),
        ],
        out_specs=pl.BlockSpec((None, ts, H), lambda b, s: (b, s, 0)),
        compiler_params=pltpu.CompilerParams(
            dimension_semantics=("parallel", "parallel"),
            vmem_limit_bytes=VMEM_LIMIT),
    )(word_e, pos_e, type_e,
      gamma.reshape(1, H).astype(jnp.float32),
      beta.reshape(1, H).astype(jnp.float32))


def mha_attention(qkv, add_mask, seq_len, out_dtype=jnp.bfloat16,
                  tq_cap=256, tkv_cap=512):
    """Flash-style multi-head attention reading directly from the fused QKV slab.
    qkv: [B, S, 3, NH, D] bf16 (a free view of the [M,3H] projection output).
    add_mask: [B, 1, S] f32 additive (-1e9 on padded keys).
    seq_len: [B] int32 valid lengths (scalar-prefetched; fully padded kv tiles
    are skipped). Output: [B, S, NH, D] bf16 == [M, H] after a free reshape."""
    B, S, _, NH, D = qkv.shape
    scale = 1.0 / math.sqrt(D)
    tq = _pick_tile(S, tq_cap, 8)
    tkv = _pick_tile(S, tkv_cap, 128)

    def kernel(len_ref, q_ref, k_ref, v_ref, msk_ref, o_ref, m_sc, l_sc, acc_sc):
        b = pl.program_id(0)
        kv_i = pl.program_id(2)

        @pl.when(kv_i == 0)
        def _init():
            m_sc[...] = jnp.full_like(m_sc, -1e30)
            l_sc[...] = jnp.zeros_like(l_sc)
            acc_sc[...] = jnp.zeros_like(acc_sc)

        @pl.when(kv_i * tkv < len_ref[b])        # skip fully-padded kv tiles
        def _body():
            # q/k/v tiles arrive in [rows, NH, D] layout straight from the QKV
            # projection; relayout to head-leading in VMEM (no HBM round trip).
            q = q_ref[...] * scale               # fold 1/sqrt(D) into q (bf16)
            qh = pltpu.einshape("qhd->hqd", q)            # (NH, tq, D)
            kh = pltpu.einshape("khd->hkd", k_ref[...])   # (NH, tkv, D)
            vh = pltpu.einshape("khd->hkd", v_ref[...])   # (NH, tkv, D)

            s = jnp.einsum("hqd,hkd->hqk", qh, kh,
                           preferred_element_type=jnp.float32)
            s = s + msk_ref[...]                 # (1, tkv) additive key mask

            m_new = jnp.maximum(m_sc[...], jnp.max(s, axis=-1, keepdims=True))
            alpha = jnp.exp(m_sc[...] - m_new)
            p = jnp.exp(s - m_new)
            l_sc[...] = alpha * l_sc[...] + jnp.sum(p, axis=-1, keepdims=True)
            acc_sc[...] = alpha * acc_sc[...] + jnp.einsum(
                "hqk,hkd->hqd", p.astype(vh.dtype), vh,
                preferred_element_type=jnp.float32)
            m_sc[...] = m_new

        @pl.when(kv_i == pl.num_programs(2) - 1)
        def _fin():
            out = acc_sc[...] / l_sc[...]        # exact divide, once per q tile
            # store in (tq, NH, D) so the result is already [M, H] outside
            o_ref[...] = pltpu.einshape("hqd->qhd", out).astype(o_ref.dtype)

    return pl.pallas_call(
        kernel,
        out_shape=jax.ShapeDtypeStruct((B, S, NH, D), out_dtype),
        grid_spec=pltpu.PrefetchScalarGridSpec(
            num_scalar_prefetch=1,
            grid=(B, S // tq, S // tkv),
            in_specs=[
                # Q / K / V planes selected out of the same [B,S,3,NH,D] slab
                pl.BlockSpec((None, tq, None, NH, D),
                             lambda b, qi, ki, sl: (b, qi, 0, 0, 0)),
                pl.BlockSpec((None, tkv, None, NH, D),
                             lambda b, qi, ki, sl: (b, ki, 1, 0, 0)),
                pl.BlockSpec((None, tkv, None, NH, D),
                             lambda b, qi, ki, sl: (b, ki, 2, 0, 0)),
                pl.BlockSpec((None, 1, tkv),
                             lambda b, qi, ki, sl: (b, 0, ki)),
            ],
            out_specs=pl.BlockSpec((None, tq, NH, D),
                                   lambda b, qi, ki, sl: (b, qi, 0, 0)),
            scratch_shapes=[
                pltpu.VMEM((NH, tq, 1), jnp.float32),   # running max m
                pltpu.VMEM((NH, tq, 1), jnp.float32),   # running denom l
                pltpu.VMEM((NH, tq, D), jnp.float32),   # output accumulator
            ],
        ),
        compiler_params=pltpu.CompilerParams(
            dimension_semantics=("parallel", "parallel", "arbitrary"),
            vmem_limit_bytes=VMEM_LIMIT),
    )(seq_len, qkv, qkv, qkv, add_mask)


def pooler_classifier(cls_tok, pool_w, pool_b, out_w_pad, out_b_pad):
    """Fused BERT pooler (tanh(cls @ Wp + bp)), eval-mode dropout (identity) and
    Linear(H,1). Classifier weight is zero-padded to 128 lanes so the store is
    lane-dense; the real logit lives in column 0."""
    B, H = cls_tok.shape
    NP = out_w_pad.shape[1]

    def kernel(x_ref, pw_ref, pb_ref, ow_ref, ob_ref, o_ref):
        pooled = jnp.dot(x_ref[...], pw_ref[...],
                         preferred_element_type=jnp.float32)
        pooled = jnp.tanh(pooled + pb_ref[...])
        # nn.Dropout(0.4) is identity at inference (eval mode)
        logit = jnp.dot(pooled.astype(ow_ref.dtype), ow_ref[...],
                        preferred_element_type=jnp.float32)
        o_ref[...] = logit + ob_ref[...]

    return pl.pallas_call(
        kernel,
        out_shape=jax.ShapeDtypeStruct((B, NP), jnp.float32),
        grid=(1,),
        in_specs=[
            pl.BlockSpec((B, H), lambda i: (0, 0)),
            pl.BlockSpec((H, H), lambda i: (0, 0)),
            pl.BlockSpec((1, H), lambda i: (0, 0)),
            pl.BlockSpec((H, NP), lambda i: (0, 0)),
            pl.BlockSpec((1, NP), lambda i: (0, 0)),
        ],
        out_specs=pl.BlockSpec((B, NP), lambda i: (0, 0)),
    )(cls_tok, pool_w, pool_b.reshape(1, H).astype(jnp.float32),
      out_w_pad, out_b_pad.reshape(1, NP).astype(jnp.float32))


# ---------------------------------------------------------------------------
# Parameters (deterministic, synthetic) and forward pass
# ---------------------------------------------------------------------------

def init_params(key, cfg):
    H, I = cfg["hidden"], cfg["intermediate"]
    std = 0.02

    def nrm(k, shape, dtype=jnp.bfloat16):
        return (std * jax.random.normal(k, shape, dtype=jnp.float32)).astype(dtype)

    keys = iter(jax.random.split(key, 8 + cfg["layers"] * 8))

    out_w_col = nrm(next(keys), (H, 1), jnp.float32)        # Linear(H, 1) weight
    params = {
        "word_emb": nrm(next(keys), (cfg["vocab"], H), jnp.float32),
        "pos_emb": nrm(next(keys), (cfg["max_pos"], H), jnp.float32),
        "type_emb": nrm(next(keys), (cfg["type_vocab"], H), jnp.float32),
        "emb_ln_g": jnp.ones((H,), jnp.float32),
        "emb_ln_b": jnp.zeros((H,), jnp.float32),
        "pool_w": nrm(next(keys), (H, H)),
        "pool_b": jnp.zeros((H,), jnp.float32),
        # classifier weight padded to a 128-wide lane-dense slab (col 0 is real)
        "out_w_pad": jnp.pad(out_w_col, ((0, 0), (0, 127))).astype(jnp.bfloat16),
        "out_b_pad": jnp.zeros((128,), jnp.float32),
        "layers": [],
    }
    for _ in range(cfg["layers"]):
        layer = {
            # fused QKV projection weight [H, 3H]
            "qkv_w": jnp.concatenate(
                [nrm(next(keys), (H, H)), nrm(next(keys), (H, H)),
                 nrm(next(keys), (H, H))], axis=1),
            "qkv_b": jnp.zeros((3 * H,), jnp.float32),
            "o_w": nrm(next(keys), (H, H)), "o_b": jnp.zeros((H,), jnp.float32),
            "ln1_g": jnp.ones((H,), jnp.float32), "ln1_b": jnp.zeros((H,), jnp.float32),
            "i_w": nrm(next(keys), (H, I)), "i_b": jnp.zeros((I,), jnp.float32),
            "f_w": nrm(next(keys), (I, H)), "f_b": jnp.zeros((H,), jnp.float32),
            "ln2_g": jnp.ones((H,), jnp.float32), "ln2_b": jnp.zeros((H,), jnp.float32),
        }
        params["layers"].append(layer)
    return params


def bert_classification_forward(params, ids, mask, token_type_ids, cfg):
    B, S = ids.shape
    H = cfg["hidden"]
    NH = cfg["heads"]
    D = H // NH
    M = B * S

    # --- embeddings: gathers are plain-JAX glue; sum + LN fused in one kernel ---
    word_e = params["word_emb"][ids]                       # [B,S,H] f32
    type_e = params["type_emb"][token_type_ids]            # [B,S,H] f32
    pos_e = params["pos_emb"][:S]                          # [S,H]  f32
    h = embed_layer_norm(word_e, pos_e, type_e,
                         params["emb_ln_g"], params["emb_ln_b"]).reshape(M, H)

    add_mask = ((1.0 - mask.astype(jnp.float32)) * -1e9).reshape(B, 1, S)
    seq_len = jnp.maximum(jnp.sum(mask.astype(jnp.int32), axis=1), 1)   # [B] int32

    # --- transformer encoder layers ---
    for layer in params["layers"]:
        # fused QKV projection: one tiled bf16 MXU matmul, f32 accumulation
        qkv = dense(h, layer["qkv_w"], layer["qkv_b"])      # [M, 3H] bf16
        qkv5 = qkv.reshape(B, S, 3, NH, D)                  # free view, no copy

        # flash-style attention straight from the QKV slab; output already [M,H]
        ctx = mha_attention(qkv5, add_mask, seq_len).reshape(M, H)

        # output projection fused with bias + residual-add + LayerNorm
        h = dense_add_ln(ctx, layer["o_w"], layer["o_b"], h,
                         layer["ln1_g"], layer["ln1_b"])

        # FFN: GELU up-projection, then down-projection fused with residual + LN
        inter = dense(h, layer["i_w"], layer["i_b"], act="gelu")    # [M, I]
        h = dense_add_ln(inter, layer["f_w"], layer["f_b"], h,
                         layer["ln2_g"], layer["ln2_b"])

    # --- pooler + dropout(0.4, eval=identity) + Linear(H,1), fused ---
    # TODO(synk): training-mode dropout (p=0.4) with pltpu.prng_random_bits not implemented.
    cls = h.reshape(B, S, H)[:, 0, :]                       # [B, H] bf16
    logits_pad = pooler_classifier(cls, params["pool_w"], params["pool_b"],
                                   params["out_w_pad"], params["out_b_pad"])
    return logits_pad[:, :1]                                # [B, 1] f32


# ---------------------------------------------------------------------------

if __name__ == "__main__":
    cfg = dict(hidden=32, heads=4, layers=2, intermediate=64,
               vocab=50, max_pos=16, type_vocab=2)
    B, S = 2, 8

    key = jax.random.PRNGKey(0)
    pkey, ikey = jax.random.split(key)
    params = init_params(pkey, cfg)

    ids = jax.random.randint(ikey, (B, S), 0, cfg["vocab"], dtype=jnp.int32)
    mask = jnp.ones((B, S), dtype=jnp.int32).at[1, 6:].set(0)   # pad last 2 tokens of example 1
    token_type_ids = jnp.zeros((B, S), dtype=jnp.int32)

    out = bert_classification_forward(params, ids, mask, token_type_ids, cfg)
    out = jax.block_until_ready(out)
    assert out.shape == (B, 1) and out.dtype == jnp.float32
    print("KERNEL_OK")
</pallas_src>

<mosaic_0001>
module attributes {stable_mosaic.version = 11 : i64} {
  func.func @kernel(%arg0: i32, %arg1: i32, %arg2: memref<1x8x32xf32, #tpu.memory_space<vmem>>, %arg3: memref<8x32xf32, #tpu.memory_space<vmem>>, %arg4: memref<1x8x32xf32, #tpu.memory_space<vmem>>, %arg5: memref<1x32xf32, #tpu.memory_space<vmem>>, %arg6: memref<1x32xf32, #tpu.memory_space<vmem>>, %arg7: memref<1x8x32xbf16, #tpu.memory_space<vmem>>) attributes {dimension_semantics = [#tpu.dimension_semantics<parallel>, #tpu.dimension_semantics<parallel>], iteration_bounds = array<i64: 2, 1>, scalar_prefetch = 0 : i64, scratch_operands = 0 : i64, tpu.core_type = #tpu.core_type<tc>, window_params = [{transform_indices = @transform_0, window_bounds = array<i64: 1, 8, 32>}, {transform_indices = @transform_1, window_bounds = array<i64: 8, 32>}, {transform_indices = @transform_2, window_bounds = array<i64: 1, 8, 32>}, {pipeline_mode = #tpu.pipeline_mode<synchronous>, transform_indices = @transform_3, window_bounds = array<i64: 1, 32>}, {pipeline_mode = #tpu.pipeline_mode<synchronous>, transform_indices = @transform_4, window_bounds = array<i64: 1, 32>}, {transform_indices = @transform_5, window_bounds = array<i64: 1, 8, 32>}]} {
    %c0 = arith.constant 0 : index
    %c0_0 = arith.constant 0 : index
    %c0_1 = arith.constant 0 : index
    %0 = vector.load %arg2[%c0, %c0_0, %c0_1] : memref<1x8x32xf32, #tpu.memory_space<vmem>>, vector<1x8x32xf32>
    %1 = vector.shape_cast %0 : vector<1x8x32xf32> to vector<8x32xf32>
    %c0_2 = arith.constant 0 : index
    %c0_3 = arith.constant 0 : index
    %2 = vector.load %arg3[%c0_2, %c0_3] : memref<8x32xf32, #tpu.memory_space<vmem>>, vector<8x32xf32>
    %3 = arith.addf %1, %2 : vector<8x32xf32>
    %c0_4 = arith.constant 0 : index
    %c0_5 = arith.constant 0 : index
    %c0_6 = arith.constant 0 : index
    %4 = vector.load %arg4[%c0_4, %c0_5, %c0_6] : memref<1x8x32xf32, #tpu.memory_space<vmem>>, vector<1x8x32xf32>
    %5 = vector.shape_cast %4 : vector<1x8x32xf32> to vector<8x32xf32>
    %6 = arith.addf %3, %5 : vector<8x32xf32>
    %cst = arith.constant dense<0.000000e+00> : vector<8xf32>
    %7 = vector.multi_reduction <add>, %6, %cst [1] : vector<8x32xf32> to vector<8xf32>
    %8 = vector.shape_cast %7 : vector<8xf32> to vector<8x1xf32>
    %cst_7 = arith.constant 3.200000e+01 : f32
    %9 = vector.broadcast %cst_7 : f32 to vector<8x1xf32>
    %10 = arith.divf %8, %9 : vector<8x1xf32>
    %11 = vector.broadcast %10 : vector<8x1xf32> to vector<8x32xf32>
    %12 = arith.subf %6, %11 : vector<8x32xf32>
    %13 = arith.mulf %12, %12 : vector<8x32xf32>
    %cst_8 = arith.constant dense<0.000000e+00> : vector<8xf32>
    %14 = vector.multi_reduction <add>, %13, %cst_8 [1] : vector<8x32xf32> to vector<8xf32>
    %15 = vector.shape_cast %14 : vector<8xf32> to vector<8x1xf32>
    %cst_9 = arith.constant 3.200000e+01 : f32
    %16 = vector.broadcast %cst_9 : f32 to vector<8x1xf32>
    %17 = arith.divf %15, %16 : vector<8x1xf32>
    %cst_10 = arith.constant 9.99999996E-13 : f32
    %18 = vector.broadcast %cst_10 : f32 to vector<8x1xf32>
    %19 = arith.addf %17, %18 : vector<8x1xf32>
    %20 = math.rsqrt %19 : vector<8x1xf32>
    %21 = vector.broadcast %20 : vector<8x1xf32> to vector<8x32xf32>
    %22 = arith.mulf %12, %21 : vector<8x32xf32>
    %c0_11 = arith.constant 0 : index
    %c0_12 = arith.constant 0 : index
    %23 = vector.load %arg5[%c0_11, %c0_12] : memref<1x32xf32, #tpu.memory_space<vmem>>, vector<1x32xf32>
    %24 = vector.broadcast %23 : vector<1x32xf32> to vector<8x32xf32>
    %25 = arith.mulf %22, %24 : vector<8x32xf32>
    %c0_13 = arith.constant 0 : index
    %c0_14 = arith.constant 0 : index
    %26 = vector.load %arg6[%c0_13, %c0_14] : memref<1x32xf32, #tpu.memory_space<vmem>>, vector<1x32xf32>
    %27 = vector.broadcast %26 : vector<1x32xf32> to vector<8x32xf32>
    %28 = arith.addf %25, %27 : vector<8x32xf32>
    %29 = arith.truncf %28 : vector<8x32xf32> to vector<8x32xbf16>
    %c0_15 = arith.constant 0 : index
    %c0_16 = arith.constant 0 : index
    %c0_17 = arith.constant 0 : index
    %30 = vector.load %arg7[%c0_15, %c0_16, %c0_17] : memref<1x8x32xbf16, #tpu.memory_space<vmem>>, vector<1x8x32xbf16>
    %31 = vector.shape_cast %30 : vector<1x8x32xbf16> to vector<8x32xbf16>
    %32 = vector.shape_cast %29 : vector<8x32xbf16> to vector<1x8x32xbf16>
    tpu.vector_store %arg7[%c0_15, %c0_16, %c0_17], %32 {strides = array<i32>} : memref<1x8x32xbf16, #tpu.memory_space<vmem>>, vector<1x8x32xbf16>,
    return
  }
  func.func @transform_0(%arg0: i32, %arg1: i32) -> (i32, i32, i32) {
    %c0_i32 = arith.constant 0 : i32
    %c0_i32_0 = arith.constant 0 : i32
    return %arg0, %arg1, %c0_i32 : i32, i32, i32
  }
  func.func @transform_1(%arg0: i32, %arg1: i32) -> (i32, i32) {
    %c0_i32 = arith.constant 0 : i32
    %c0_i32_0 = arith.constant 0 : i32
    return %arg1, %c0_i32 : i32, i32
  }
  func.func @transform_2(%arg0: i32, %arg1: i32) -> (i32, i32, i32) {
    %c0_i32 = arith.constant 0 : i32
    %c0_i32_0 = arith.constant 0 : i32
    return %arg0, %arg1, %c0_i32 : i32, i32, i32
  }
  func.func @transform_3(%arg0: i32, %arg1: i32) -> (i32, i32) {
    %c0_i32 = arith.constant 0 : i32
    %c0_i32_0 = arith.constant 0 : i32
    %c0_i32_1 = arith.constant 0 : i32
    return %c0_i32, %c0_i32_0 : i32, i32
  }
  func.func @transform_4(%arg0: i32, %arg1: i32) -> (i32, i32) {
    %c0_i32 = arith.constant 0 : i32
    %c0_i32_0 = arith.constant 0 : i32
    %c0_i32_1 = arith.constant 0 : i32
    return %c0_i32, %c0_i32_0 : i32, i32
  }
  func.func @transform_5(%arg0: i32, %arg1: i32) -> (i32, i32, i32) {
    %c0_i32 = arith.constant 0 : i32
    %c0_i32_0 = arith.constant 0 : i32
    return %arg0, %arg1, %c0_i32 : i32, i32, i32
  }
}

</mosaic_0001>

<bundles_post_ra>
// kernel: tpu_custom_call.1
= control target key start
LH: loop header
LB: loop body
LE: loop exit
PB: predicated region body
PF: predicated region fallthrough
CT: control target
= control target key end

     0   :  { %s1057_s0 = inlined_call_operand.hbm [shape: f32[2,8,32], index: 0, kind: input, shape index: {}]   ;;  %s1058_s1 = inlined_call_operand.hbm [shape: f32[8,32], index: 1, kind: input, shape index: {}]   ;;  %s1059_s2 = inlined_call_operand.hbm [shape: f32[2,8,32], index: 2, kind: input, shape index: {}]   ;;  %s1060_s3 = inlined_call_operand.vmem [shape: f32[1,32], index: 3, kind: input, shape index: {}]   ;;  %s1061_s4 = inlined_call_operand.vmem [shape: f32[1,32], index: 4, kind: input, shape index: {}]   ;;  %s1062_s5 = inlined_call_operand.hbm [shape: bf16[2,8,32], index: 5, kind: output, shape index: {}]  }
   0x1   :  { %1069 = sst [smem:[#allocation14_spill]] %s1057_s0 }
   0x2   :  { %10 = vsyncpa [#allocation3], 0 }
   0x3   :  { %12 = vsyncpa [#allocation3 + $0x1], 0 }
   0x4   :  { %13 = vsyncpa [#allocation6], 0 }
   0x5   :  { %14 = vsyncpa [#allocation4], 0 }
   0x6   :  { %16 = vsyncpa [#allocation4 + $0x1], 0  ;;  %s795_s18 = smov 0   ;;  %s797_s19 = smov 0  }
   0x7   :  { %s799_s20 = smov 0   ;;  %s801_s21 = smov 0  }
   0x8   :  { %s803_s22 = smov 0   ;;  %s805_s23 = smov 0  }
   0x9 LB: > { %s34_s24 = sadd.s32 1, %s755_s22  ;;  %s43_s25 = sadd.s32 1, %s747_s20  ;;  %s759_s23 = sphi %s805_s23, %s22_s23   ;;  %s755_s22 = sphi %s803_s22, %s1093_s22   ;;  %s751_s21 = sphi %s801_s21, %s1092_s21   ;;  %s747_s20 = sphi %s799_s20, %s1091_s20   ;;  %s743_s19 = sphi %s797_s19, %s1090_s19   ;;  %s739_s18 = sphi %s795_s18, %s1089_s18  }
   0xa   : > { %p36_p0 = scmp.ge.s32.totalorder %s34_s24, 2  ;;  %p50_p1 = scmp.ne.s32.totalorder %s747_s20, %s743_s19 }
   0xb   : > { %p51_p2 = scmp.eq.s32.totalorder %s759_s23, 0  ;;  %p527_p5 = scmp.lt.s32.totalorder %s759_s23, 2 }
   0xc   : > { %s1095_s24 = smov (%p36_p0, %s34_s24), 0  ;;  %s223_s27 = sand.u32 1, %s759_s23  }
   0xd   : > { %1070 = sst [smem:[#allocation13_spill]] %s1095_s24  ;;  %p52_p4 = por %p51_p2, %p50_p1 }
   0xe   : > { %s38_s26 = ssub.s32 %s755_s22, %s1095_s24  ;;  %s225_s28 = sand.u32 1, %s747_s20  }
   0xf   : > { %p41_p6 = scmp.eq.s32.totalorder %s38_s26, 0  ;;  %s487_s29 = sshll.u32 %s755_s22, 7 }
  0x10   : > { %s845_s6 = sshll.u32 %s225_s28, 3  ;;  %s1071_s0 = sld [smem:[#allocation14_spill]] }
  0x11   : > { %s843_s30 = scalar_select %p41_p6, %s747_s20, %s43_s25  }
  0x12   : > { %p854_p7 = pnand %p527_p5, %p52_p4  ;;  %s227_s11 = scalar_lea.vmem [#allocation2], %s845_s6 }
  0x13   : > { %s235_s12 = sshll.u32 %s227_s11, 4  ;;  %s861_s13 = scalar_lea.sflag [#allocation3], %s223_s27  ;;  %s859_s12 = int_to_ptr.vmem [resolvable:$true] %s235_s12 }
  0x14   : > { %p583_p9 = pneg %p854_p7 }
  0x16   : > { %s852_s9 = scalar_lea.hbm %s1071_s0, %s487_s29  ;;  %s586_s17 = scalar_lea.hbm %s1071_s0, 256 }
  0x17   : > { %s581_s14 = scalar_lea.hbm %s852_s9, 128  ;;  %p587_p12 = scmp.lt.u32.totalorder %s852_s9, %s1071_s0 }
  0x18   : > { %p582_p8 = scmp.ne.s32.totalorder %s852_s9, %s581_s14  ;;  %p588_p13 = scmp.lt.u32.totalorder %s586_s17, %s581_s14 }
  0x19   : > { %p590_p2 = scmp.lt.u32.totalorder %s581_s14, %s852_s9 }
  0x1a   : > { %p584_p10 = pnand %p583_p9, %p582_p8  ;;  %p589_p0 = por %p588_p13, %p587_p12 }
  0x1c   : > { %p585_p11 = pneg %p584_p10  ;;  %p591_p4 = por %p590_p2, %p589_p0 }
  0x1e   : > { %p592_p5 = pnand %p591_p4, %p585_p11 }
  0x20   : > { %595 = shalt.err (!%p592_p5)
}
  0x21   : > { %s596_s27 = scalar_lea.vmem %s859_s12, 128  ;;  %s761_s28 = smov [#allocation2]  }
  0x22   : > { %p597_p6 = scmp.ne.s32.totalorder %s859_s12, %s596_s27  ;;  %s601_s7 = sshll.u32 %s761_s28, 4  ;;  %s602_s7 = int_to_ptr.vmem [resolvable:$false] %s601_s7 }
  0x23   : > { %s603_s8 = scalar_lea.vmem %s602_s7, 256  ;;  %p604_p3 = scmp.lt.s32.totalorder %s859_s12, %s602_s7 }
  0x24   : > { %p599_p8 = pnand %p597_p6, %p583_p9  ;;  %p605_p12 = scmp.lt.s32.totalorder %s603_s8, %s596_s27 }
  0x26   : > { %p600_p10 = pneg %p599_p8  ;;  %p606_p13 = por %p605_p12, %p604_p3 }
  0x28   : > { %p607_p0 = pnand %p606_p13, %p600_p10 }
  0x2a   : > { %610 = shalt.err (!%p607_p0)
}
  0x2b   : > { %518 = dma.hbm_to_vmem [thread:$0]  (!%p854_p7), %s852_s9, 128, %s859_s12, %s861_s13  }
  0x2c   : > { %s890_s11 = sadd.s32 4294967295, %s759_s23   ;;  %s482_s14 = sadd.s32 4294967294, %s759_s23  }
  0x2d   : > { %p56_p3 = scmp.ne.s32.totalorder %s743_s19, %s739_s18  ;;  %p1064_p11 = scmp.eq.s32.totalorder %s890_s11, 0 }
  0x2e   : > { %p178_p2 = scmp.eq.s32.totalorder %s890_s11, 1  ;;  %p184_p4 = scmp.eq.s32.totalorder %s482_s14, 1 }
  0x2f   : > { %p483_p5 = scmp.ge.s32.totalorder %s759_s23, 1  ;;  %p900_p6 = por %p1064_p11, %p56_p3 }
  0x30   : > { %p907_p8 = por %p178_p2, %p50_p1  ;;  %p911_p10 = por %p184_p4, %p56_p3 }
  0x31   : > { %s1073_s15 = scalar_select %p900_p6, 1, 0 }
  0x32   : > { %s1074_s9 = scalar_select %p907_p8, 1, 0 }
  0x33   : > { %s1075_s12 = scalar_select %p911_p10, 1, 0 }
  0x34   : > { %p191_p12 = scmp.lt.s32.totalorder %s759_s23, 3  ;;  %s921_s25 = scalar_lea.hbm %s1059_s2, %s487_s29 }
  0x35   : > { %s762_s27 = smov [#allocation5]   ;;  %s246_s7 = scalar_lea.vmem [#allocation7], %s845_s6 }
  0x36   : > { %p923_p13 = pnand %p483_p5, %p191_p12  ;;  %s927_s28 = sshll.u32 %s762_s27, 4  ;;  %s207_s28 = int_to_ptr.vmem [resolvable:$true] %s927_s28 }
  0x37   : > { %s254_s8 = sshll.u32 %s246_s7, 4  ;;  %s611_s14 = scalar_lea.hbm %s921_s25, 128  ;;  %s255_s8 = int_to_ptr.vmem [resolvable:$true] %s254_s8 }
  0x38   : > { %s1076_s26 = scalar_select %p923_p13, 1, 0 }
  0x39   : > { %p612_p0 = scmp.ne.s32.totalorder %s921_s25, %s611_s14  ;;  %s616_s17 = scalar_lea.hbm %s1059_s2, 256 }
  0x3a   : > { %p617_p4 = scmp.lt.u32.totalorder %s921_s25, %s1059_s2  ;;  %p618_p5 = scmp.lt.u32.totalorder %s616_s17, %s611_s14 }
  0x3b   : > { %p614_p3 = pnand %p612_p0, %p583_p9  ;;  %p620_p11 = scmp.lt.u32.totalorder %s611_s14, %s921_s25 }
  0x3c   : > { %p619_p12 = por %p618_p5, %p617_p4 }
  0x3d   : > { %p615_p2 = pneg %p614_p3 }
  0x3e   : > { %p621_p10 = por %p620_p11, %p619_p12 }
  0x40   : > { %p622_p1 = pnand %p621_p10, %p615_p2 }
  0x42   : > { %625 = shalt.err (!%p622_p1)
}
  0x43   : > { %s626_s6 = scalar_lea.vmem %s255_s8, 128  ;;  %s763_s27 = smov [#allocation7]  }
  0x44   : > { %p627_p8 = scmp.ne.s32.totalorder %s255_s8, %s626_s6  ;;  %s631_s7 = sshll.u32 %s763_s27, 4  ;;  %s632_s7 = int_to_ptr.vmem [resolvable:$false] %s631_s7 }
  0x45   : > { %s633_s29 = scalar_lea.vmem %s632_s7, 256  ;;  %p634_p6 = scmp.lt.s32.totalorder %s255_s8, %s632_s7 }
  0x46   : > { %p629_p0 = pnand %p627_p8, %p583_p9  ;;  %p635_p13 = scmp.lt.s32.totalorder %s633_s29, %s626_s6 }
  0x48   : > { %p630_p3 = pneg %p629_p0  ;;  %p636_p4 = por %p635_p13, %p634_p6 }
  0x4a   : > { %p637_p5 = pnand %p636_p4, %p630_p3 }
  0x4c   : > { %640 = shalt.err (!%p637_p5)
}
  0x4d   : > { %521 = dma.hbm_to_vmem [thread:$0]  (!%p854_p7), %s921_s25, 128, %s255_s8, %s861_s13  }
  0x4e   : > { %p1077_p9 = scmp.eq.s32.totalorder %s890_s11, 0  ;;  %p1078_p11 = scmp.ne.s32.totalorder %s1076_s26, 0 }
  0x4f   : > { %s641_s16 = scalar_lea.hbm %s1058_s1, 128 }
  0x50   : > { %p1079_p8 = pneg %p1078_p11  ;;  %p642_p6 = scmp.ne.s32.totalorder %s1058_s1, %s641_s16 }
  0x51   : > { %p648_p2 = scmp.lt.u32.totalorder %s641_s16, %s1058_s1 }
  0x52   : > { %p958_p10 = pnand %p1079_p8, %p1077_p9 }
  0x54   : > { %p643_p13 = pneg %p958_p10 }
  0x56   : > { %p644_p7 = pnand %p643_p13, %p642_p6 }
  0x58   : > { %p645_p1 = pneg %p644_p7 }
  0x5a   : > { %p650_p12 = pnand %p648_p2, %p645_p1 }
  0x5c   : > { %653 = shalt.err (!%p650_p12)
}
  0x5d   : > { %s654_s8 = scalar_lea.vmem %s207_s28, 128  ;;  %p662_p5 = scmp.lt.s32.totalorder %s207_s28, %s207_s28 }
  0x5e   : > { %p655_p0 = scmp.ne.s32.totalorder %s207_s28, %s654_s8  ;;  %p663_p9 = scmp.lt.s32.totalorder %s654_s8, %s654_s8 }
  0x60   : > { %p657_p3 = pnand %p655_p0, %p643_p13  ;;  %p664_p8 = por %p663_p9, %p662_p5 }
  0x62   : > { %p658_p4 = pneg %p657_p3 }
  0x64   : > { %p665_p11 = pnand %p664_p8, %p658_p4 }
  0x66   : > { %668 = shalt.err (!%p665_p11)
}
  0x67   : > { %514 = dma.hbm_to_vmem [thread:$0]  (!%p958_p10), %s1058_s1, 128, %s207_s28, [#allocation6]  }
  0x68   : > { %p1081_p6 = scmp.ne.s32.totalorder %s1076_s26, 0 }
  0x69   : > { %s265_s7 = sand.u32 (!%p1081_p6), 1, %s890_s11   ;;  %s982_s29 = sand.u32 (!%p1081_p6), 1, %s743_s19  }
  0x6a   : > { %263 = sbr.rel (%p1081_p6) target bundleno = 454 (0x1c6), region = 40  ;;  %s491_s24 = sshll.u32 (!%p1081_p6), %s982_s29, 3 }
  0x6b   : > { %s266_s14 = scalar_lea.sflag (!%p1081_p6), [#allocation3], %s265_s7  ;;  %s269_s16 = scalar_lea.vmem (!%p1081_p6), [#allocation2], %s491_s24 }
  0x6c   : > { %p1082_p11 = scmp.ne.s32.totalorder (!%p1081_p6), %s1073_s15, 0 }
  0x71   : > { %722 = dma.done.wait (%p1082_p11), %s266_s14, 128  }
  0x72   : > { %724 = vsyncadd (%p1082_p11), %s266_s14, 4294967168  ;;  %p1083_p10 = scmp.eq.s32.totalorder %s890_s11, 0 }
  0x74   : > { %726 = dma.done.wait (%p1083_p10), [#allocation6], 128   ;;  %p1084_p13 = pmov %p1083_p10 }
  0x75   : > { %s282_s26 = scalar_lea.vmem [#allocation7], %s491_s24 }
  0x76   : > { %728 = vsyncadd (%p1084_p13), [#allocation6], 4294967168 }
  0x77   : > { %730 = dma.done.wait (%p1082_p11), %s266_s14, 128  }
  0x78   : > { %732 = vsyncadd (%p1082_p11), %s266_s14, 4294967168  ;;  %v314_v0 = vld [vmem:[%s269_s16] sm:$0xff]  ;;  %v315_v1 = vld [vmem:[#allocation5] sm:$0xff]  ;;  %vm319_vm0 = vcmask 261120   ;;  %s494_s11 = sshll.u32 %s982_s29, 2  ;;  %s498_s17 = sshll.u32 %s751_s21, 6 }
  0x79   : > { %v317_v2 = vld [vmem:[%s282_s26] sm:$0xff]  ;;  %v316_v3 = vadd.f32 %v315_v1, %v314_v0  ;;  %s313_s13 = scalar_lea.vmem [#allocation8], %s494_s11  ;;  %vm351_vm1 = vcmask 257024   ;;  %s1008_s27 = scalar_lea.hbm %s1062_s5, %s498_s17 }
  0x7a   : > { %v495_v15 = vld [vmem:[%s1060_s3] ss:$0 sm:$0xff]  ;;  %s368_s25 = sshll.u32 %s313_s13, 4  ;;  %s354_s7 = scalar_lea.sflag [#allocation4], %s982_s29  ;;  %s1010_s25 = int_to_ptr.vmem [resolvable:$true] %s368_s25 }
  0x7b   : > { %v318_v4 = vadd.f32 %v317_v2, %v316_v3  ;;  %v496_v17 = vld [vmem:[%s1061_s4] ss:$0 sm:$0xff]  ;;  %s669_s24 = scalar_lea.vmem %s1010_s25, 64  ;;  %p1085_p1 = scmp.ne.s32.totalorder %s1074_s9, 0 }
  0x7c   : > { %p670_p7 = scmp.ne.s32.totalorder %s1010_s25, %s669_s24  ;;  %s764_s21 = smov [#allocation8]  }
  0x7d   : > { %v320_v5 = vsel %vm319_vm0, %v318_v4, 0.0  ;;  %s673_s14 = sshll.u32 %s764_s21, 4  ;;  %s674_s14 = int_to_ptr.vmem [resolvable:$false] %s673_s14 }
  0x7e   : > { %321 = vadd.xlane.f32.xlu0 %v320_v5  ;;  %p671_p2 = pnand %p670_p7, %p1085_p1  ;;  %s675_s16 = scalar_lea.vmem %s674_s14, 128 }
  0x7f   : > { %p676_p0 = scmp.lt.s32.totalorder %s1010_s25, %s674_s14  ;;  %p677_p3 = scmp.lt.s32.totalorder %s675_s16, %s669_s24 }
  0x80   : > { %p672_p12 = pneg %p671_p2 }
  0x81   : > { %p678_p4 = por %p677_p3, %p676_p0 }
  0x83   : > { %p679_p5 = pnand %p678_p4, %p672_p12 }
 0x10b   : > { %v322_v6 = vpop.xlane.xlu0 %321 }
 0x10c   : > { %v324_v7 = vmul.f32 0.03125, %v322_v6 }
 0x10e   : > { %v325_v8 = vsub.f32 %v318_v4, %v324_v7 }
 0x110   : > { %v326_v9 = vmul.f32 %v325_v8, %v325_v8 }
 0x112   : > { %v327_v10 = vsel %vm319_vm0, %v326_v9, 0.0 }
 0x113   : > { %328 = vadd.xlane.f32.xlu0 %v327_v10 }
 0x1a0   : > { %v329_v11 = vpop.xlane.xlu0 %328 }
 0x1a1   : > { %v330_v12 = vmul.f32 0.03125, %v329_v11 }
 0x1a3   : > { %v331_v13 = vadd.f32 1e-12, %v330_v12 }
 0x1a5   : > { %579 = vrsqrt.f32 %v331_v13 }
 0x1af   : > { %v580_v14 = vpop.eup %579 }
 0x1b0   : > { %v333_v16 = vmul.f32 %v580_v14, %v325_v8 }
 0x1b2   : > { %v341_v18 = vmul.f32 %v495_v15, %v333_v16 }
 0x1b4   : > { %v349_v19 = vadd.f32 %v496_v17, %v341_v18 }
 0x1b6   : > { %v350_v20 = vpack.c.bf16 %v349_v19, %v349_v19 }
 0x1b8   : > { %352 = vst.msk [vmem:[%s313_s13] sm:$0xf] %vm351_vm1, %v350_v20 }
 0x1b9   : > { %682 = shalt.err (!%p679_p5)
}
 0x1ba   : > { %s683_s29 = scalar_lea.hbm %s1008_s27, 64  ;;  %s687_s15 = scalar_lea.hbm %s1062_s5, 128 }
 0x1bb   : > { %p684_p9 = scmp.ne.s32.totalorder %s1008_s27, %s683_s29  ;;  %p688_p11 = scmp.lt.u32.totalorder %s1008_s27, %s1062_s5 }
 0x1bc   : > { %p689_p10 = scmp.lt.u32.totalorder %s687_s15, %s683_s29  ;;  %p691_p7 = scmp.lt.u32.totalorder %s683_s29, %s1008_s27 }
 0x1bd   : > { %p685_p8 = pnand %p684_p9, %p1085_p1 }
 0x1be   : > { %p690_p13 = por %p689_p10, %p688_p11 }
 0x1bf   : > { %p686_p6 = pneg %p685_p8 }
 0x1c0   : > { %p692_p2 = por %p691_p7, %p690_p13 }
 0x1c2   : > { %p693_p12 = pnand %p692_p2, %p686_p6 }
 0x1c4   : > { %696 = shalt.err (!%p693_p12)
}
 0x1c5   : > { %509 = dma.vmem_to_hbm [thread:$0]  (%p1085_p1), %s1010_s25, 64, %s1008_s27, %s354_s7  }
 0x1c6 PF: > { %s380_s10 = sand.u32 1, %s739_s18   ;;  %p1086_p0 = scmp.ne.s32.totalorder %s1075_s12, 0 }
 0x1c7   : > { %p1087_p3 = scmp.ge.s32.totalorder %s759_s23, 2  ;;  %s381_s17 = scalar_lea.sflag [#allocation4], %s380_s10 }
 0x1c9   : > { %p523_p4 = pnand %p1087_p3, %p1086_p0 }
 0x1cb   : > { %734 = dma.done.wait (!%p523_p4), %s381_s17, 64  }
 0x1cc   : > { %736 = vsyncadd (!%p523_p4), %s381_s17, 4294967232  ;;  %s22_s23 = sadd.s32 1, %s759_s23   ;;  %s1088_s9 = sld [smem:[#allocation13_spill]] }
 0x1cd   : > { %p19_p5 = scmp.ge.s32.totalorder %s22_s23, 4   ;;  %s1089_s18 = smov %s743_s19 }
 0x1ce   : > { %s1090_s19 = smov %s747_s20  ;;  %s1091_s20 = smov %s843_s30 }
 0x1cf   : > { %s1092_s21 = smov %s755_s22  ;;  %21 = sbr.rel (!%p19_p5) target bundleno = 9 (0x9), region = 101 }
 0x1d2   : > { %s1093_s22 = smov %s1088_s9 }
 0x1d6   :  { %386 = vsyncpa [#allocation3], 1 }
 0x1d7   :  { %388 = vsyncpa [#allocation3 + $0x1], 1 }
 0x1d8   :  { %389 = vsyncpa [#allocation6], 1 }
 0x1d9   :  { %390 = vsyncpa [#allocation4], 1 }
 0x1da   :  { %392 = vsyncpa [#allocation4 + $0x1], 1 }

</bundles_post_ra>
